<compile_context>
chip_gen: v7x
topology: tpu7x:2x2x1
jax: 0.10.0
libtpu: 0.0.40
codegen_flags: <defaults>
</compile_context>

<pallas_src>
import functools

import jax
import jax.numpy as jnp
from jax import lax
from jax.experimental import pallas as pl
from jax.experimental.pallas import tpu as pltpu


def _mha_kernel(x_ref, wk_ref, wq_ref, wv_ref, bk_ref, bq_ref, bv_ref, o_ref, *,
                num_heads, hidden_size, block_b, proj_precision, approx_recip):
    NH, H = num_heads, hidden_size
    rows, S = x_ref.shape
    Bb = block_b
    C = rows // Bb

    # f32 copy of x for the residual / identity-concat path (exact even when
    # the matmuls run in bf16); cast separately for the MXU operands.
    x2 = x_ref[...].astype(jnp.float32)                  # (Bb*C, S)
    xm = x2.astype(wk_ref.dtype)                         # matmul operand (bf16 default)

    # Fused projections for every head in one wide matmul each, natural
    # (M,K)x(K,N) form against the pre-transposed VMEM-resident weights.
    k = jnp.dot(xm, wk_ref[...], precision=proj_precision,
                preferred_element_type=jnp.float32) + bk_ref[...]   # (Bb*C, NH*H)
    q = jnp.dot(xm, wq_ref[...], precision=proj_precision,
                preferred_element_type=jnp.float32) + bq_ref[...]   # (Bb*C, NH*H)
    v = jnp.dot(xm, wv_ref[...], precision=proj_precision,
                preferred_element_type=jnp.float32) + bv_ref[...]   # (Bb*C, NH*S)

    x3 = x2.reshape(Bb, C, S)
    # The attention-core matmuls are tiny ((C,H)x(H,C), (C,C)x(C,S)) and
    # MXU-latency-bound regardless of precision, so keep them exact f32.
    attn_precision = lax.Precision.HIGHEST

    for h in range(NH):                                   # static unroll, NH is small
        kh = k[:, h * H:(h + 1) * H].reshape(Bb, C, H)
        qh = q[:, h * H:(h + 1) * H].reshape(Bb, C, H)
        vh = v[:, h * S:(h + 1) * S].reshape(Bb, C, S)

        # scores[b, i, j] = q[b, i] . k[b, j]  (== q.matmul(k.mT) in torch)
        scores = jnp.einsum('bid,bjd->bij', qh, kh, precision=attn_precision,
                            preferred_element_type=jnp.float32)
        # torch F.softmax(scores, dim=1): normalize over the query index i.
        m = jnp.max(scores, axis=1, keepdims=True)
        e = jnp.exp(scores - m)
        denom = jnp.sum(e, axis=1, keepdims=True)
        phi = e * pl.reciprocal(denom, approx=approx_recip)

        out_h = jnp.einsum('bij,bjs->bis', phi, vh, precision=attn_precision,
                           preferred_element_type=jnp.float32) + x3
        # Full (C, S) plane store per head: no sublane-masked partial stores.
        o_ref[:, h] = out_h.astype(o_ref.dtype)

    # torch.cat([...heads..., x], dim=1): trailing plane is x itself (f32-exact).
    o_ref[:, NH] = x3.astype(o_ref.dtype)


def _physical_vmem_bytes():
    try:
        info = pltpu.get_tpu_info()
        v = getattr(info, "vmem_capacity_bytes", None)
        if v:
            return int(v)
    except Exception:
        pass
    return 64 * 1024 * 1024          # conservative fallback: v7x per-core VMEM


def _vmem_budget_bytes(block_b, C, S, NH, H, w_itm, o_itm):
    """Working-set estimate including in-kernel intermediates (k/q/v, scores)."""
    rows = block_b * C
    f32 = 4
    x_bytes = 2 * rows * S * f32                                  # x block (double-buffered)
    out_bytes = 2 * block_b * (NH + 1) * C * S * o_itm            # output block (double-buffered)
    w_bytes = 2 * (2 * NH * H * S + NH * S * S) * w_itm           # resident weights (2 pipeline bufs)
    b_bytes = 2 * NH * (2 * H + S) * f32                          # packed biases
    interm = (2 * rows * NH * H + rows * NH * S) * f32            # k, q, v (f32 accum)
    interm += 3 * block_b * C * C * f32                           # scores / exp / phi (per head live)
    interm += 2 * block_b * C * S * f32                           # out_h + x3
    return x_bytes + out_bytes + w_bytes + b_bytes + interm


def _pick_block_b(B, C, S, NH, H, w_itm, o_itm, vmem_cap):
    """Batch rows per grid step: ~256 MXU rows/step, >=4 grid steps when B
    allows (2 per v7x TensorCore), layout-legal row count (block_b*C % 8 == 0
    or the full batch), and a working set that fits the per-generation cap."""
    legal = sorted({bb for bb in range(1, B + 1)
                    if B % bb == 0 and ((bb * C) % 8 == 0 or bb == B)})
    target = max(1, -(-256 // max(C, 1)))                 # ~256 rows per step
    if B >= 4:
        target = min(target, max(1, B // 4))              # >=4 grid steps
    elif B >= 2:
        target = min(target, max(1, B // 2))
    below = [bb for bb in legal if bb <= target]
    bb = max(below) if below else min(legal)
    idx = legal.index(bb)
    while idx > 0 and _vmem_budget_bytes(bb, C, S, NH, H, w_itm, o_itm) > vmem_cap:
        idx -= 1
        bb = legal[idx]
    return bb


def multi_head_attention(x, wk, bk, wq, bq, wv, bv, *, block_b=None,
                         compute_dtype=jnp.bfloat16, approx_softmax_recip=False,
                         single_buffer_weights=False):
    """x: (B, C, S); wk/wq: (NH, H, S); wv: (NH, S, S); bk/bq: (NH, H); bv: (NH, S).

    Returns (B, (NH + 1) * C, S) == torch.cat([head_0(x), ..., head_{NH-1}(x), x], 1).
    compute_dtype=None runs faithful f32 (Precision.HIGHEST) matmuls.
    """
    B, C, S = x.shape
    NH, H, _ = wk.shape
    out_dtype = x.dtype

    # Host-side packing: one zero-copy reshape + a ONE-TIME transpose so the
    # kernel contracts in natural (M,K)x(K,N) form against resident weights.
    w_dtype = compute_dtype if compute_dtype is not None else x.dtype
    wkT = jnp.transpose(wk.reshape(NH * H, S)).astype(w_dtype)   # (S, NH*H)
    wqT = jnp.transpose(wq.reshape(NH * H, S)).astype(w_dtype)   # (S, NH*H)
    wvT = jnp.transpose(wv.reshape(NH * S, S)).astype(w_dtype)   # (S, NH*S)
    bk_p = bk.reshape(1, NH * H).astype(jnp.float32)
    bq_p = bq.reshape(1, NH * H).astype(jnp.float32)
    bv_p = bv.reshape(1, NH * S).astype(jnp.float32)

    phys_vmem = _physical_vmem_bytes()
    vmem_cap = (phys_vmem * 3) // 4                      # ~48 MiB v7x, ~96 MiB v5e/v6e

    w_itm = jnp.dtype(w_dtype).itemsize
    o_itm = jnp.dtype(out_dtype).itemsize
    if block_b is None:
        block_b = _pick_block_b(B, C, S, NH, H, w_itm, o_itm, vmem_cap)
    assert B % block_b == 0, (B, block_b)
    nb = B // block_b

    budget = _vmem_budget_bytes(block_b, C, S, NH, H, w_itm, o_itm)
    vmem_limit = int(min(max(budget + budget // 2, 32 * 1024 * 1024), vmem_cap))

    # Sublane-dense input slab (zero-copy): block rows = block_b*C (multiple of 8).
    x2d = x.reshape(B * C, S)

    proj_precision = (lax.Precision.HIGHEST if compute_dtype is None
                      else lax.Precision.DEFAULT)        # bf16 operands -> native MXU rate

    kernel = functools.partial(
        _mha_kernel, num_heads=NH, hidden_size=H, block_b=block_b,
        proj_precision=proj_precision, approx_recip=approx_softmax_recip)

    # Constant index maps -> weights/biases DMA'd once, resident across steps.
    weight_mode = ({"pipeline_mode": pl.Buffered(1)}
                   if single_buffer_weights else {})

    def wspec(shape):
        return pl.BlockSpec(shape, lambda i: tuple(0 for _ in shape), **weight_mode)

    out4 = pl.pallas_call(
        kernel,
        out_shape=jax.ShapeDtypeStruct((B, NH + 1, C, S), out_dtype),
        grid_spec=pltpu.PrefetchScalarGridSpec(
            num_scalar_prefetch=0,
            grid=(nb,),
            in_specs=[
                pl.BlockSpec((block_b * C, S), lambda i: (i, 0)),      # x (f32)
                wspec((S, NH * H)),                                    # Wk^T packed
                wspec((S, NH * H)),                                    # Wq^T packed
                wspec((S, NH * S)),                                    # Wv^T packed
                wspec((1, NH * H)),                                    # bk packed
                wspec((1, NH * H)),                                    # bq packed
                wspec((1, NH * S)),                                    # bv packed
            ],
            out_specs=pl.BlockSpec((block_b, NH + 1, C, S),
                                   lambda i: (i, 0, 0, 0)),
        ),
        compiler_params=pltpu.CompilerParams(
            dimension_semantics=("parallel",),
            vmem_limit_bytes=vmem_limit),
    )(x2d, wkT, wqT, wvT, bk_p, bq_p, bv_p)

    # (B, NH+1, C, S) -> (B, (NH+1)*C, S): contiguous, zero-copy.
    return out4.reshape(B, (NH + 1) * C, S)


def init_params(key, seq_len, hidden_size, num_heads):
    """Deterministic init mimicking nn.Linear default (uniform +-1/sqrt(in))."""
    ks = jax.random.split(key, 6)
    s = 1.0 / (seq_len ** 0.5)
    wk = jax.random.uniform(ks[0], (num_heads, hidden_size, seq_len), jnp.float32, -s, s)
    bk = jax.random.uniform(ks[1], (num_heads, hidden_size), jnp.float32, -s, s)
    wq = jax.random.uniform(ks[2], (num_heads, hidden_size, seq_len), jnp.float32, -s, s)
    bq = jax.random.uniform(ks[3], (num_heads, hidden_size), jnp.float32, -s, s)
    wv = jax.random.uniform(ks[4], (num_heads, seq_len, seq_len), jnp.float32, -s, s)
    bv = jax.random.uniform(ks[5], (num_heads, seq_len), jnp.float32, -s, s)
    return wk, bk, wq, bq, wv, bv


def reference(x, wk, bk, wq, bq, wv, bv, compute_dtype=None):
    """Pure-JAX replica of the PyTorch forward.  With compute_dtype set it
    mirrors the kernel's mixed-precision scheme (low-precision matmul operands,
    f32 accumulation, f32 residual / identity path)."""
    dt = compute_dtype
    xm = x if dt is None else x.astype(dt)
    with jax.default_matmul_precision("highest"):
        outs = []
        for h in range(wk.shape[0]):
            wkh = wk[h] if dt is None else wk[h].astype(dt)
            wqh = wq[h] if dt is None else wq[h].astype(dt)
            wvh = wv[h] if dt is None else wv[h].astype(dt)
            k = jnp.dot(xm, wkh.T, preferred_element_type=jnp.float32) + bk[h]
            q = jnp.dot(xm, wqh.T, preferred_element_type=jnp.float32) + bq[h]
            v = jnp.dot(xm, wvh.T, preferred_element_type=jnp.float32) + bv[h]
            scores = jnp.einsum('bih,bjh->bij', q, k)
            phi = jax.nn.softmax(scores, axis=1)          # torch dim=1
            outs.append(jnp.einsum('bij,bjs->bis', phi, v) + x)
        outs.append(x)
        return jnp.concatenate(outs, axis=1)


if __name__ == "__main__":
    B, C, S, H, NH = 2, 4, 16, 32, 2   # batch, channels, seq_len, hidden, heads
    key = jax.random.PRNGKey(0)
    kx, kp = jax.random.split(key)
    x = jax.random.normal(kx, (B, C, S), jnp.float32)
    params = init_params(kp, S, H, NH)

    # Exact f32 path: tight parity against the full-precision reference.
    out_f32 = jax.block_until_ready(
        multi_head_attention(x, *params, compute_dtype=None))
    ref_f32 = reference(x, *params)
    assert out_f32.shape == (B, (NH + 1) * C, S), out_f32.shape
    err_f32 = float(jnp.max(jnp.abs(out_f32 - ref_f32)))
    assert jnp.allclose(out_f32, ref_f32, atol=1e-4, rtol=1e-4), err_f32

    # Default (bf16 MXU) path: parity against a reference using the same
    # mixed-precision scheme (bf16 operands, f32 accumulation, f32 residual).
    out_bf16 = jax.block_until_ready(multi_head_attention(x, *params))
    ref_bf16 = reference(x, *params, compute_dtype=jnp.bfloat16)
    assert out_bf16.shape == (B, (NH + 1) * C, S), out_bf16.shape
    err_bf16 = float(jnp.max(jnp.abs(out_bf16 - ref_bf16)))
    assert jnp.allclose(out_bf16, ref_bf16, atol=2e-3, rtol=2e-3), err_bf16

    print("KERNEL_OK")
</pallas_src>

<mosaic_0001>
module attributes {stable_mosaic.version = 11 : i64} {
  func.func @_mha_kernel(%arg0: i32, %arg1: memref<8x16xf32, #tpu.memory_space<vmem>>, %arg2: memref<16x64xf32, #tpu.memory_space<vmem>>, %arg3: memref<16x64xf32, #tpu.memory_space<vmem>>, %arg4: memref<16x32xf32, #tpu.memory_space<vmem>>, %arg5: memref<1x64xf32, #tpu.memory_space<vmem>>, %arg6: memref<1x64xf32, #tpu.memory_space<vmem>>, %arg7: memref<1x32xf32, #tpu.memory_space<vmem>>, %arg8: memref<2x3x4x16xf32, #tpu.memory_space<vmem>>) attributes {dimension_semantics = [#tpu.dimension_semantics<parallel>], iteration_bounds = array<i64: 1>, scalar_prefetch = 0 : i64, scratch_operands = 0 : i64, tpu.core_type = #tpu.core_type<tc>, window_params = [{transform_indices = @transform_0, window_bounds = array<i64: 8, 16>}, {pipeline_mode = #tpu.pipeline_mode<synchronous>, transform_indices = @transform_1, window_bounds = array<i64: 16, 64>}, {pipeline_mode = #tpu.pipeline_mode<synchronous>, transform_indices = @transform_2, window_bounds = array<i64: 16, 64>}, {pipeline_mode = #tpu.pipeline_mode<synchronous>, transform_indices = @transform_3, window_bounds = array<i64: 16, 32>}, {pipeline_mode = #tpu.pipeline_mode<synchronous>, transform_indices = @transform_4, window_bounds = array<i64: 1, 64>}, {pipeline_mode = #tpu.pipeline_mode<synchronous>, transform_indices = @transform_5, window_bounds = array<i64: 1, 64>}, {pipeline_mode = #tpu.pipeline_mode<synchronous>, transform_indices = @transform_6, window_bounds = array<i64: 1, 32>}, {transform_indices = @transform_7, window_bounds = array<i64: 2, 3, 4, 16>}]} {
    %c0 = arith.constant 0 : index
    %c0_0 = arith.constant 0 : index
    %0 = vector.load %arg1[%c0, %c0_0] : memref<8x16xf32, #tpu.memory_space<vmem>>, vector<8x16xf32>
    %c0_1 = arith.constant 0 : index
    %c0_2 = arith.constant 0 : index
    %1 = vector.load %arg2[%c0_1, %c0_2] : memref<16x64xf32, #tpu.memory_space<vmem>>, vector<16x64xf32>
    %cst = arith.constant dense<0.000000e+00> : vector<8x64xf32>
    %2 = tpu.matmul %0, %1, %cst {dimension_numbers = #tpu.dot_dimension_numbers<[1], [0], [0], [1], [0, 0, 1, 1], [], []>, precision = #tpu.contract_precision<fp32>} : vector<8x16xf32>, vector<16x64xf32>, vector<8x64xf32> -> vector<8x64xf32>
    %c0_3 = arith.constant 0 : index
    %c0_4 = arith.constant 0 : index
    %3 = vector.load %arg5[%c0_3, %c0_4] : memref<1x64xf32, #tpu.memory_space<vmem>>, vector<1x64xf32>
    %4 = vector.broadcast %3 : vector<1x64xf32> to vector<8x64xf32>
    %5 = arith.addf %2, %4 : vector<8x64xf32>
    %c0_5 = arith.constant 0 : index
    %c0_6 = arith.constant 0 : index
    %6 = vector.load %arg3[%c0_5, %c0_6] : memref<16x64xf32, #tpu.memory_space<vmem>>, vector<16x64xf32>
    %cst_7 = arith.constant dense<0.000000e+00> : vector<8x64xf32>
    %7 = tpu.matmul %0, %6, %cst_7 {dimension_numbers = #tpu.dot_dimension_numbers<[1], [0], [0], [1], [0, 0, 1, 1], [], []>, precision = #tpu.contract_precision<fp32>} : vector<8x16xf32>, vector<16x64xf32>, vector<8x64xf32> -> vector<8x64xf32>
    %c0_8 = arith.constant 0 : index
    %c0_9 = arith.constant 0 : index
    %8 = vector.load %arg6[%c0_8, %c0_9] : memref<1x64xf32, #tpu.memory_space<vmem>>, vector<1x64xf32>
    %9 = vector.broadcast %8 : vector<1x64xf32> to vector<8x64xf32>
    %10 = arith.addf %7, %9 : vector<8x64xf32>
    %c0_10 = arith.constant 0 : index
    %c0_11 = arith.constant 0 : index
    %11 = vector.load %arg4[%c0_10, %c0_11] : memref<16x32xf32, #tpu.memory_space<vmem>>, vector<16x32xf32>
    %cst_12 = arith.constant dense<0.000000e+00> : vector<8x32xf32>
    %12 = tpu.matmul %0, %11, %cst_12 {dimension_numbers = #tpu.dot_dimension_numbers<[1], [0], [0], [1], [0, 0, 1, 1], [], []>, precision = #tpu.contract_precision<fp32>} : vector<8x16xf32>, vector<16x32xf32>, vector<8x32xf32> -> vector<8x32xf32>
    %c0_13 = arith.constant 0 : index
    %c0_14 = arith.constant 0 : index
    %13 = vector.load %arg7[%c0_13, %c0_14] : memref<1x32xf32, #tpu.memory_space<vmem>>, vector<1x32xf32>
    %14 = vector.broadcast %13 : vector<1x32xf32> to vector<8x32xf32>
    %15 = arith.addf %12, %14 : vector<8x32xf32>
    %16 = vector.shape_cast %0 : vector<8x16xf32> to vector<2x4x16xf32>
    %17 = vector.extract_strided_slice %5 {offsets = [0, 0], sizes = [8, 32], strides = [1, 1]} : vector<8x64xf32> to vector<8x32xf32>
    %18 = vector.shape_cast %17 : vector<8x32xf32> to vector<2x4x32xf32>
    %19 = vector.extract_strided_slice %10 {offsets = [0, 0], sizes = [8, 32], strides = [1, 1]} : vector<8x64xf32> to vector<8x32xf32>
    %20 = vector.shape_cast %19 : vector<8x32xf32> to vector<2x4x32xf32>
    %21 = vector.extract_strided_slice %15 {offsets = [0, 0], sizes = [8, 16], strides = [1, 1]} : vector<8x32xf32> to vector<8x16xf32>
    %22 = vector.shape_cast %21 : vector<8x16xf32> to vector<2x4x16xf32>
    "tpu.trace_start"() <{level = 10 : i32, message = "bid,bjd->bij"}> : () -> ()
    %cst_15 = arith.constant dense<0.000000e+00> : vector<2x4x4xf32>
    %23 = tpu.matmul %20, %18, %cst_15 {dimension_numbers = #tpu.dot_dimension_numbers<[2], [2], [1], [1], [0, 0, 0, 1, 1, 1], [0], [0]>, precision = #tpu.contract_precision<fp32>} : vector<2x4x32xf32>, vector<2x4x32xf32>, vector<2x4x4xf32> -> vector<2x4x4xf32>
    "tpu.trace_stop"() : () -> ()
    %cst_16 = arith.constant dense<0xFF800000> : vector<2x4xf32>
    %24 = vector.multi_reduction <maximumf>, %23, %cst_16 [1] : vector<2x4x4xf32> to vector<2x4xf32>
    %25 = vector.shape_cast %24 : vector<2x4xf32> to vector<2x1x4xf32>
    %26 = vector.broadcast %25 : vector<2x1x4xf32> to vector<2x4x4xf32>
    %27 = arith.subf %23, %26 : vector<2x4x4xf32>
    %28 = math.exp %27 : vector<2x4x4xf32>
    %cst_17 = arith.constant dense<0.000000e+00> : vector<2x4xf32>
    %29 = vector.multi_reduction <add>, %28, %cst_17 [1] : vector<2x4x4xf32> to vector<2x4xf32>
    %30 = vector.shape_cast %29 : vector<2x4xf32> to vector<2x1x4xf32>
    %31 = tpu.reciprocal %30 : vector<2x1x4xf32> -> vector<2x1x4xf32>
    %32 = vector.broadcast %31 : vector<2x1x4xf32> to vector<2x4x4xf32>
    %33 = arith.mulf %28, %32 : vector<2x4x4xf32>
    "tpu.trace_start"() <{level = 10 : i32, message = "bij,bjs->bis"}> : () -> ()
    %cst_18 = arith.constant dense<0.000000e+00> : vector<2x4x16xf32>
    %34 = tpu.matmul %33, %22, %cst_18 {dimension_numbers = #tpu.dot_dimension_numbers<[2], [1], [1], [2], [0, 0, 0, 1, 1, 2], [0], [0]>, precision = #tpu.contract_precision<fp32>} : vector<2x4x4xf32>, vector<2x4x16xf32>, vector<2x4x16xf32> -> vector<2x4x16xf32>
    "tpu.trace_stop"() : () -> ()
    %35 = arith.addf %34, %16 : vector<2x4x16xf32>
    %c0_19 = arith.constant 0 : index
    %c0_20 = arith.constant 0 : index
    %c0_21 = arith.constant 0 : index
    %c0_22 = arith.constant 0 : index
    %36 = vector.load %arg8[%c0_19, %c0_20, %c0_21, %c0_22] : memref<2x3x4x16xf32, #tpu.memory_space<vmem>>, vector<2x1x4x16xf32>
    %37 = vector.shape_cast %36 : vector<2x1x4x16xf32> to vector<2x4x16xf32>
    %38 = vector.shape_cast %35 : vector<2x4x16xf32> to vector<2x1x4x16xf32>
    tpu.vector_store %arg8[%c0_19, %c0_20, %c0_21, %c0_22], %38 {strides = array<i32>} : memref<2x3x4x16xf32, #tpu.memory_space<vmem>>, vector<2x1x4x16xf32>,
    %39 = vector.extract_strided_slice %5 {offsets = [0, 32], sizes = [8, 32], strides = [1, 1]} : vector<8x64xf32> to vector<8x32xf32>
    %40 = vector.shape_cast %39 : vector<8x32xf32> to vector<2x4x32xf32>
    %41 = vector.extract_strided_slice %10 {offsets = [0, 32], sizes = [8, 32], strides = [1, 1]} : vector<8x64xf32> to vector<8x32xf32>
    %42 = vector.shape_cast %41 : vector<8x32xf32> to vector<2x4x32xf32>
    %43 = vector.extract_strided_slice %15 {offsets = [0, 16], sizes = [8, 16], strides = [1, 1]} : vector<8x32xf32> to vector<8x16xf32>
    %44 = vector.shape_cast %43 : vector<8x16xf32> to vector<2x4x16xf32>
    "tpu.trace_start"() <{level = 10 : i32, message = "bid,bjd->bij"}> : () -> ()
    %cst_23 = arith.constant dense<0.000000e+00> : vector<2x4x4xf32>
    %45 = tpu.matmul %42, %40, %cst_23 {dimension_numbers = #tpu.dot_dimension_numbers<[2], [2], [1], [1], [0, 0, 0, 1, 1, 1], [0], [0]>, precision = #tpu.contract_precision<fp32>} : vector<2x4x32xf32>, vector<2x4x32xf32>, vector<2x4x4xf32> -> vector<2x4x4xf32>
    "tpu.trace_stop"() : () -> ()
    %cst_24 = arith.constant dense<0xFF800000> : vector<2x4xf32>
    %46 = vector.multi_reduction <maximumf>, %45, %cst_24 [1] : vector<2x4x4xf32> to vector<2x4xf32>
    %47 = vector.shape_cast %46 : vector<2x4xf32> to vector<2x1x4xf32>
    %48 = vector.broadcast %47 : vector<2x1x4xf32> to vector<2x4x4xf32>
    %49 = arith.subf %45, %48 : vector<2x4x4xf32>
    %50 = math.exp %49 : vector<2x4x4xf32>
    %cst_25 = arith.constant dense<0.000000e+00> : vector<2x4xf32>
    %51 = vector.multi_reduction <add>, %50, %cst_25 [1] : vector<2x4x4xf32> to vector<2x4xf32>
    %52 = vector.shape_cast %51 : vector<2x4xf32> to vector<2x1x4xf32>
    %53 = tpu.reciprocal %52 : vector<2x1x4xf32> -> vector<2x1x4xf32>
    %54 = vector.broadcast %53 : vector<2x1x4xf32> to vector<2x4x4xf32>
    %55 = arith.mulf %50, %54 : vector<2x4x4xf32>
    "tpu.trace_start"() <{level = 10 : i32, message = "bij,bjs->bis"}> : () -> ()
    %cst_26 = arith.constant dense<0.000000e+00> : vector<2x4x16xf32>
    %56 = tpu.matmul %55, %44, %cst_26 {dimension_numbers = #tpu.dot_dimension_numbers<[2], [1], [1], [2], [0, 0, 0, 1, 1, 2], [0], [0]>, precision = #tpu.contract_precision<fp32>} : vector<2x4x4xf32>, vector<2x4x16xf32>, vector<2x4x16xf32> -> vector<2x4x16xf32>
    "tpu.trace_stop"() : () -> ()
    %57 = arith.addf %56, %16 : vector<2x4x16xf32>
    %c0_27 = arith.constant 0 : index
    %c1 = arith.constant 1 : index
    %c0_28 = arith.constant 0 : index
    %c0_29 = arith.constant 0 : index
    %58 = vector.load %arg8[%c0_27, %c1, %c0_28, %c0_29] : memref<2x3x4x16xf32, #tpu.memory_space<vmem>>, vector<2x1x4x16xf32>
    %59 = vector.shape_cast %58 : vector<2x1x4x16xf32> to vector<2x4x16xf32>
    %60 = vector.shape_cast %57 : vector<2x4x16xf32> to vector<2x1x4x16xf32>
    tpu.vector_store %arg8[%c0_27, %c1, %c0_28, %c0_29], %60 {strides = array<i32>} : memref<2x3x4x16xf32, #tpu.memory_space<vmem>>, vector<2x1x4x16xf32>,
    %c0_30 = arith.constant 0 : index
    %c2 = arith.constant 2 : index
    %c0_31 = arith.constant 0 : index
    %c0_32 = arith.constant 0 : index
    %61 = vector.load %arg8[%c0_30, %c2, %c0_31, %c0_32] : memref<2x3x4x16xf32, #tpu.memory_space<vmem>>, vector<2x1x4x16xf32>
    %62 = vector.shape_cast %61 : vector<2x1x4x16xf32> to vector<2x4x16xf32>
    %63 = vector.shape_cast %16 : vector<2x4x16xf32> to vector<2x1x4x16xf32>
    tpu.vector_store %arg8[%c0_30, %c2, %c0_31, %c0_32], %63 {strides = array<i32>} : memref<2x3x4x16xf32, #tpu.memory_space<vmem>>, vector<2x1x4x16xf32>,
    return
  }
  func.func @transform_0(%arg0: i32) -> (i32, i32) {
    %c0_i32 = arith.constant 0 : i32
    %c0_i32_0 = arith.constant 0 : i32
    return %arg0, %c0_i32 : i32, i32
  }
  func.func @transform_1(%arg0: i32) -> (i32, i32) {
    %c0_i32 = arith.constant 0 : i32
    %c0_i32_0 = arith.constant 0 : i32
    %c0_i32_1 = arith.constant 0 : i32
    return %c0_i32, %c0_i32_0 : i32, i32
  }
  func.func @transform_2(%arg0: i32) -> (i32, i32) {
    %c0_i32 = arith.constant 0 : i32
    %c0_i32_0 = arith.constant 0 : i32
    %c0_i32_1 = arith.constant 0 : i32
    return %c0_i32, %c0_i32_0 : i32, i32
  }
  func.func @transform_3(%arg0: i32) -> (i32, i32) {
    %c0_i32 = arith.constant 0 : i32
    %c0_i32_0 = arith.constant 0 : i32
    %c0_i32_1 = arith.constant 0 : i32
    return %c0_i32, %c0_i32_0 : i32, i32
  }
  func.func @transform_4(%arg0: i32) -> (i32, i32) {
    %c0_i32 = arith.constant 0 : i32
    %c0_i32_0 = arith.constant 0 : i32
    %c0_i32_1 = arith.constant 0 : i32
    return %c0_i32, %c0_i32_0 : i32, i32
  }
  func.func @transform_5(%arg0: i32) -> (i32, i32) {
    %c0_i32 = arith.constant 0 : i32
    %c0_i32_0 = arith.constant 0 : i32
    %c0_i32_1 = arith.constant 0 : i32
    return %c0_i32, %c0_i32_0 : i32, i32
  }
  func.func @transform_6(%arg0: i32) -> (i32, i32) {
    %c0_i32 = arith.constant 0 : i32
    %c0_i32_0 = arith.constant 0 : i32
    %c0_i32_1 = arith.constant 0 : i32
    return %c0_i32, %c0_i32_0 : i32, i32
  }
  func.func @transform_7(%arg0: i32) -> (i32, i32, i32, i32) {
    %c0_i32 = arith.constant 0 : i32
    %c0_i32_0 = arith.constant 0 : i32
    %c0_i32_1 = arith.constant 0 : i32
    %c0_i32_2 = arith.constant 0 : i32
    return %arg0, %c0_i32, %c0_i32_0, %c0_i32_1 : i32, i32, i32, i32
  }
}

</mosaic_0001>

<bundles_post_ra>
// kernel: tpu_custom_call.1
= control target key start
LH: loop header
LB: loop body
LE: loop exit
PB: predicated region body
PF: predicated region fallthrough
CT: control target
= control target key end

     0   :  { %12 = vsyncpa [#allocation3], 0  ;;  %s6574_s0 = inlined_call_operand.hbm [shape: f32[8,16], index: 0, kind: input, shape index: {}]   ;;  %s6575_s1 = inlined_call_operand.hbm [shape: f32[16,64], index: 1, kind: input, shape index: {}]   ;;  %s6576_s2 = inlined_call_operand.hbm [shape: f32[16,64], index: 2, kind: input, shape index: {}]   ;;  %s6577_s3 = inlined_call_operand.hbm [shape: f32[16,32], index: 3, kind: input, shape index: {}]   ;;  %s6578_s4 = inlined_call_operand.vmem [shape: f32[1,64], index: 4, kind: input, shape index: {}]   ;;  %s6579_s5 = inlined_call_operand.vmem [shape: f32[1,64], index: 5, kind: input, shape index: {}]   ;;  %s6580_s6 = inlined_call_operand.vmem [shape: f32[1,32], index: 6, kind: input, shape index: {}]   ;;  %s6581_s7 = inlined_call_operand.hbm [shape: f32[2,3,4,16], index: 7, kind: output, shape index: {}]  }
   0x1   :  { %13 = vsyncpa [#allocation6], 0 }
   0x2   :  { %14 = vsyncpa [#allocation9], 0 }
   0x3   :  { %15 = vsyncpa [#allocation4], 0  ;;  %s6058_s24 = smov [#allocation5]   ;;  %s5940_s28 = scalar_lea.hbm %s6575_s1, 256 }
   0x4   :  { %s31_s25 = sshll.u32 %s6058_s24, 4  ;;  %p5941_p0 = scmp.ne.s32.totalorder %s6575_s1, %s5940_s28  ;;  %s32_s25 = int_to_ptr.vmem [resolvable:$true] %s31_s25 }
   0x5   :  { %p5944_p1 = scmp.lt.u32.totalorder %s5940_s28, %s6575_s1 }
   0x7   :  { %p5946_p2 = pnand %p5944_p1, %p5941_p0 }
   0x9   :  { %5949 = shalt.err (!%p5946_p2)
}
   0xa   :  { %s5950_s10 = scalar_lea.vmem %s32_s25, 256  ;;  %p5955_p4 = scmp.lt.s32.totalorder %s32_s25, %s32_s25 }
   0xb   :  { %p5951_p3 = scmp.ne.s32.totalorder %s32_s25, %s5950_s10  ;;  %p5956_p5 = scmp.lt.s32.totalorder %s5950_s10, %s5950_s10 }
   0xd   :  { %p5957_p6 = por %p5956_p5, %p5955_p4 }
   0xf   :  { %p5958_p7 = pnand %p5957_p6, %p5951_p3 }
  0x11   :  { %5961 = shalt.err (!%p5958_p7)
}
  0x12   :  { %s6059_s11 = smov 128   ;;  %s6060_s12 = smov 8  }
  0x13   :  { %37 = dma.hbm_to_vmem [thread:$0]  %s6575_s1, 256, %s32_s25, [#allocation6], %s6059_s11, %s6059_s11, %s6060_s12  }
  0x14   :  { %s6061_s15 = smov [#allocation2]   ;;  %s6062_s17 = smov [#allocation7]  }
  0x15   :  { %s22_s16 = sshll.u32 %s6061_s15, 4  ;;  %s43_s18 = sshll.u32 %s6062_s17, 4  ;;  %s23_s16 = int_to_ptr.vmem [resolvable:$true] %s22_s16  ;;  %s44_s18 = int_to_ptr.vmem [resolvable:$true] %s43_s18 }
  0x16   :  { %s5962_s21 = scalar_lea.hbm %s6574_s0, 128 }
  0x17   :  { %p5963_p8 = scmp.ne.s32.totalorder %s6574_s0, %s5962_s21  ;;  %p5966_p9 = scmp.lt.u32.totalorder %s5962_s21, %s6574_s0 }
  0x19   :  { %p5968_p10 = pnand %p5966_p9, %p5963_p8 }
  0x1b   :  { %5971 = shalt.err (!%p5968_p10)
}
  0x1c   :  { %s5972_s1 = scalar_lea.vmem %s23_s16, 128  ;;  %p5977_p12 = scmp.lt.s32.totalorder %s23_s16, %s23_s16 }
  0x1d   :  { %p5973_p11 = scmp.ne.s32.totalorder %s23_s16, %s5972_s1  ;;  %p5978_p13 = scmp.lt.s32.totalorder %s5972_s1, %s5972_s1 }
  0x1f   :  { %p5979_p0 = por %p5978_p13, %p5977_p12 }
  0x21   :  { %p5980_p1 = pnand %p5979_p0, %p5973_p11 }
  0x23   :  { %5983 = shalt.err (!%p5980_p1)
}
  0x24   :  { %25 = dma.hbm_to_vmem [thread:$0]  %s6574_s0, 128, %s23_s16, [#allocation3]  }
  0x25   :  { %s5984_s30 = scalar_lea.hbm %s6576_s2, 256 }
  0x26   :  { %p5985_p2 = scmp.ne.s32.totalorder %s6576_s2, %s5984_s30  ;;  %p5988_p3 = scmp.lt.u32.totalorder %s5984_s30, %s6576_s2 }
  0x28   :  { %p5990_p4 = pnand %p5988_p3, %p5985_p2 }
  0x2a   :  { %5993 = shalt.err (!%p5990_p4)
}
  0x2b   :  { %s5994_s14 = scalar_lea.vmem %s44_s18, 256  ;;  %p5999_p6 = scmp.lt.s32.totalorder %s44_s18, %s44_s18 }
  0x2c   :  { %p5995_p5 = scmp.ne.s32.totalorder %s44_s18, %s5994_s14  ;;  %p6000_p7 = scmp.lt.s32.totalorder %s5994_s14, %s5994_s14 }
  0x2e   :  { %p6001_p8 = por %p6000_p7, %p5999_p6 }
  0x30   :  { %p6002_p9 = pnand %p6001_p8, %p5995_p5 }
  0x32   :  { %6005 = shalt.err (!%p6002_p9)
}
  0x33   :  { %49 = dma.hbm_to_vmem [thread:$0]  %s6576_s2, 256, %s44_s18, [#allocation6], %s6059_s11, %s6059_s11, %s6060_s12  }
  0x34   :  { %s6063_s16 = smov [#allocation8]   ;;  %s6006_s21 = scalar_lea.hbm %s6577_s3, 256 }
  0x35   :  { %s55_s17 = sshll.u32 %s6063_s16, 4  ;;  %p6007_p10 = scmp.ne.s32.totalorder %s6577_s3, %s6006_s21  ;;  %s56_s17 = int_to_ptr.vmem [resolvable:$true] %s55_s17 }
  0x36   :  { %p6010_p11 = scmp.lt.u32.totalorder %s6006_s21, %s6577_s3 }
  0x38   :  { %p6012_p12 = pnand %p6010_p11, %p6007_p10 }
  0x3a   :  { %6015 = shalt.err (!%p6012_p12)
}
  0x3b   :  { %s6016_s1 = scalar_lea.vmem %s56_s17, 256  ;;  %p6021_p0 = scmp.lt.s32.totalorder %s56_s17, %s56_s17 }
  0x3c   :  { %p6017_p13 = scmp.ne.s32.totalorder %s56_s17, %s6016_s1  ;;  %p6022_p1 = scmp.lt.s32.totalorder %s6016_s1, %s6016_s1 }
  0x3e   :  { %p6023_p2 = por %p6022_p1, %p6021_p0 }
  0x40   :  { %p6024_p3 = pnand %p6023_p2, %p6017_p13 }
  0x42   :  { %6027 = shalt.err (!%p6024_p3)
}
  0x43   :  { %61 = dma.hbm_to_vmem [thread:$0]  %s6577_s3, 256, %s56_s17, [#allocation9], %s6059_s11, %s6059_s11, %s6060_s12  }
  0x44   :  { %6050 = dma.done.wait [#allocation3], 128  }
  0x45   :  { %6051 = vsyncadd [#allocation3], 4294967168 }
  0x46   :  { %6052 = dma.done.wait [#allocation6], 512  }
  0x47   :  { %6053 = vsyncadd [#allocation6], 4294966784 }
  0x48   :  { %6054 = dma.done.wait [#allocation9], 256  }
  0x49   :  { %6055 = vsyncadd [#allocation9], 4294967040  ;;  %v6064_v0 = vmov 0.0|0.0   ;;  %vm6065_vm0 = vmmov 0   ;;  %v6066_v1 = vmov 0.0   ;;  %vm90_vm1 = vcmask 130048  }
  0x4a   :  { %5740 = vmatprep.subr.bf16.mxu1 %v6064_v0  ;;  %5749 = vmatprep.subr.bf16.mxu0 %v6064_v0  ;;  %v81_v2 = vld [vmem:[#allocation5] sm:$0xff]  ;;  %v82_v3 = vld [vmem:[#allocation5 + $0x8] sm:$0xff]  ;;  %v6175_v4 = vld [vmem:[#allocation2] sm:$0xff]  ;;  %vm1497_vm2 = vcmask 261120   ;;  %s6067_s12 = smov 96   ;;  %vm2441_vm3 = vcmask 1043456  }
  0x4b   :  { %5378 = vmatprep.mubr.msk.f32.mxu1 %vm6065_vm0, %v6066_v1  ;;  %5399 = vmatprep.mubr.msk.f32.mxu0 %vm6065_vm0, %v6066_v1  ;;  %v95_v5 = vand.u32 4294901760, %v81_v2  ;;  %v98_v6 = vand.u32 4294901760, %v82_v3  ;;  %v92_v7 = vsel %vm90_vm1, %v6175_v4, 0  ;;  %v1021_v12 = vld [vmem:[#allocation8] sm:$0xff]  ;;  %v1022_v13 = vld [vmem:[#allocation8 + $0x8] sm:$0xff]  ;;  %v553_v18 = vld [vmem:[#allocation7] sm:$0xff] }
  0x4c   :  { %v6178_v8 = vand.u32 4294901760, %v92_v7  ;;  %v554_v19 = vld [vmem:[#allocation7 + $0x8] sm:$0xff]  ;;  %v1031_v20 = vand.u32 4294901760, %v1021_v12  ;;  %v1034_v21 = vand.u32 4294901760, %v1022_v13  ;;  %v563_v28 = vand.u32 4294901760, %v553_v18 }
  0x4d   :  { %v5741_v9 = vpack.c.bf16 %v98_v6, %v95_v5  ;;  %v173_v10 = vsub.f32 %v81_v2, %v95_v5  ;;  %v180_v11 = vsub.f32 %v82_v3, %v98_v6  ;;  %v566_v29 = vand.u32 4294901760, %v554_v19  ;;  %v5221_v59 = vld [vmem:[%s6578_s4] ss:$0 sm:$0xff] }
  0x4e   :  { %v6181_v14 = vsub.f32 %v92_v7, %v6178_v8  ;;  %v6194_v31 = vsub.f32 %v1021_v12, %v1031_v20  ;;  %v6196_v32 = vsub.f32 %v1022_v13, %v1034_v21  ;;  %v6200_v34 = vsub.f32 %v553_v18, %v563_v28  ;;  %v5222_v7 = vld [vmem:[%s6579_s5] ss:$0 sm:$0xff]  ;;  %s6068_s5 = smov 112  }
  0x4f   :  { %5742 = vmatpush3.bf16.msra.mxu1 %v5741_v9  ;;  %5751 = vmatpush3.bf16.msra.mxu0 %v5741_v9  ;;  %v174_v15 = vand.u32 4294901760, %v173_v10  ;;  %v181_v16 = vand.u32 4294901760, %v180_v11  ;;  %v6202_v35 = vsub.f32 %v554_v19, %v566_v29  ;;  %v5747_v38 = vpack.c.bf16 %v180_v11, %v173_v10 }
  0x50   :  { %v6184_v17 = vand.u32 4294901760, %v6181_v14  ;;  %5743 = vmatprep.subr.bf16.mxu1 %v6064_v0  ;;  %5752 = vmatprep.subr.bf16.mxu0 %v6064_v0  ;;  %v1110_v36 = vand.u32 4294901760, %v6194_v31  ;;  %v1117_v37 = vand.u32 4294901760, %v6196_v32  ;;  %v642_v39 = vand.u32 4294901760, %v6200_v34 }
  0x51   :  { %v175_v22 = vsub.f32 %v173_v10, %v174_v15  ;;  %v182_v23 = vsub.f32 %v180_v11, %v181_v16  ;;  %v5753_v24 = vpack.c.bf16 %v181_v16, %v174_v15  ;;  %v649_v40 = vand.u32 4294901760, %v6202_v35  ;;  %v5223_v15 = vld [vmem:[%s6580_s6] ss:$0 sm:$0xff]  ;;  %s6069_s6 = smov [#allocation10]  }
  0x52   :  { %v164_v25 = vsub.f32 %v6181_v14, %v6184_v17  ;;  %5400 = vmatmul.mubr.f32.vlgmr.msra.gmra.mrb[0].mxu0 %v6184_v17  ;;  %v1111_v41 = vsub.f32 %v6194_v31, %v1110_v36  ;;  %v1118_v42 = vsub.f32 %v6196_v32, %v1117_v37  ;;  %v643_v43 = vsub.f32 %v6200_v34, %v642_v39  ;;  %s5207_s29 = sshll.u32 %s6069_s6, 4  ;;  %s5208_s29 = int_to_ptr.vmem [resolvable:$true] %s5207_s29 }
  0x53   :  { %v176_v26 = vand.u32 4294901760, %v175_v22  ;;  %v183_v27 = vand.u32 4294901760, %v182_v23  ;;  %5754 = vmatpush3.bf16.msra.mxu0 %v5753_v24  ;;  %5406 = vmatprep.mubr.msk.f32.mxu0 %vm6065_vm0, %v6066_v1  ;;  %v650_v44 = vsub.f32 %v6202_v35, %v649_v40  ;;  %v5777_v45 = vpack.c.bf16 %v1034_v21, %v1031_v20  ;;  %s6028_s30 = scalar_lea.vmem %s5208_s29, 384  ;;  %p6033_p5 = scmp.lt.s32.totalorder %s5208_s29, %s5208_s29 }
  0x54   :  { %v165_v30 = vand.u32 4294901760, %v164_v25  ;;  %5755 = vmatprep.subr.bf16.mxu0 %v6064_v0  ;;  %v1112_v46 = vand.u32 4294901760, %v1111_v41  ;;  %v1119_v47 = vand.u32 4294901760, %v1118_v42  ;;  %v5759_v48 = vpack.c.bf16 %v566_v29, %v563_v28  ;;  %p6029_p4 = scmp.ne.s32.totalorder %s5208_s29, %s6028_s30  ;;  %p6034_p6 = scmp.lt.s32.totalorder %s6028_s30, %s6028_s30 }
  0x55   :  { %v5744_v33 = vpack.c.bf16 %v183_v27, %v176_v26  ;;  %v644_v49 = vand.u32 4294901760, %v643_v43  ;;  %v651_v50 = vand.u32 4294901760, %v650_v44  ;;  %v5783_v53 = vpack.c.bf16 %v6196_v32, %v6194_v31 }
  0x56   :  { %5379 = vmatmul.mubr.f32.vlgmr.msra.gmra.mrb[0].mxu1 %v165_v30  ;;  %v5780_v51 = vpack.c.bf16 %v1119_v47, %v1112_v46  ;;  %v5765_v54 = vpack.c.bf16 %v6202_v35, %v6200_v34  ;;  %v5789_v55 = vpack.c.bf16 %v1117_v37, %v1110_v36  ;;  %v5771_v56 = vpack.c.bf16 %v649_v40, %v642_v39  ;;  %p6035_p7 = por %p6034_p6, %p6033_p5 }
  0x57   :  { %5745 = vmatpush3.bf16.msra.mxu1 %v5744_v33  ;;  %5385 = vmatprep.mubr.msk.f32.mxu1 %vm6065_vm0, %v6066_v1  ;;  %v5762_v52 = vpack.c.bf16 %v651_v50, %v644_v49  ;;  %vm2398_vm4 = vcmask 27648   ;;  %vm2437_vm5 = vcmask 31744   ;;  %vm3341_vm6 = vcmask 125952  }
  0x58   :  { %5746 = vmatprep.subr.bf16.mxu1 %v6064_v0  ;;  %5200 = vst.msk [vmem:[#allocation10 + $0x8] sm:$0xf] %vm3341_vm6, %v6175_v4  ;;  %p6036_p8 = pnand %p6035_p7, %p6029_p4 }
  0x5a   :  { %5407 = vmatmul.mubr.f32.vlgmr.msra.gmra.mrb[0].mxu0 %v6178_v8 }
  0x5b   :  { %5757 = vmatpush3.bf16.msra.mxu0 %v5741_v9  ;;  %5413 = vmatprep.mubr.msk.f32.mxu0 %vm6065_vm0, %v6066_v1 }
  0x5c   :  { %5776 = vmatprep.subr.bf16.mxu0 %v6064_v0 }
  0x5e   :  { %5386 = vmatmul.mubr.f32.vlgmr.msra.gmra.mrb[0].mxu1 %v6178_v8 }
  0x5f   :  { %5748 = vmatpush3.bf16.msra.mxu1 %v5747_v38  ;;  %5392 = vmatprep.mubr.msk.f32.mxu1 %vm6065_vm0, %v6066_v1 }
  0x60   :  { %5758 = vmatprep.subr.bf16.mxu1 %v6064_v0 }
  0x62   :  { %5414 = vmatmul.mubr.f32.vlgmr.msra.gmra.mrb[0].mxu0 %v6178_v8 }
  0x63   :  { %5778 = vmatpush3.bf16.msra.mxu0 %v5777_v45  ;;  %5462 = vmatprep.mubr.msk.f32.mxu0 %vm6065_vm0, %v6066_v1 }
  0x64   :  { %5779 = vmatprep.subr.bf16.mxu0 %v6064_v0 }
  0x66   :  { %5393 = vmatmul.mubr.f32.vlgmr.msra.gmra.mrb[0].mxu1 %v6181_v14  ;;  %5463 = vmatmul.mubr.f32.vlgmr.msra.gmra.mrb[2].mxu0 %v165_v30 }
  0x67   :  { %5760 = vmatpush3.bf16.msra.mxu1 %v5759_v48  ;;  %5420 = vmatprep.mubr.msk.f32.mxu1 %vm6065_vm0, %v6066_v1 }
  0x68   :  { %5761 = vmatprep.subr.bf16.mxu1 %v6064_v0  ;;  %5781 = vmatpush3.bf16.msra.mxu0 %v5780_v51 }
  0x69   :  { %5469 = vmatprep.mubr.msk.f32.mxu0 %vm6065_vm0, %v6066_v1  ;;  %5782 = vmatprep.subr.bf16.mxu0 %v6064_v0 }
  0x6a   :  { %5421 = vmatmul.mubr.f32.vlgmr.msra.gmra.mrb[2].mxu1 %v165_v30 }
  0x6b   :  { %5763 = vmatpush3.bf16.msra.mxu1 %v5762_v52  ;;  %5427 = vmatprep.mubr.msk.f32.mxu1 %vm6065_vm0, %v6066_v1 }
  0x6c   :  { %5764 = vmatprep.subr.bf16.mxu1 %v6064_v0 }
  0x6e   :  { %5470 = vmatmul.mubr.f32.vlgmr.msra.gmra.mrb[2].mxu0 %v6178_v8 }
  0x6f   :  { %5784 = vmatpush3.bf16.msra.mxu0 %v5783_v53  ;;  %5476 = vmatprep.mubr.msk.f32.mxu0 %vm6065_vm0, %v6066_v1 }
  0x70   :  { %5785 = vmatprep.subr.bf16.mxu0 %v6064_v0 }
  0x72   :  { %5428 = vmatmul.mubr.f32.vlgmr.msra.gmra.mrb[2].mxu1 %v6178_v8 }
  0x73   :  { %5766 = vmatpush3.bf16.msra.mxu1 %v5765_v54  ;;  %5434 = vmatprep.mubr.msk.f32.mxu1 %vm6065_vm0, %v6066_v1 }
  0x74   :  { %5767 = vmatprep.subr.bf16.mxu1 %v6064_v0 }
  0x76   :  { %5477 = vmatmul.mubr.f32.vlgmr.msra.gmra.mrb[2].mxu0 %v6181_v14 }
  0x77   :  { %5787 = vmatpush3.bf16.msra.mxu0 %v5777_v45  ;;  %5483 = vmatprep.mubr.msk.f32.mxu0 %vm6065_vm0, %v6066_v1 }
  0x78   :  { %5788 = vmatprep.subr.bf16.mxu0 %v6064_v0 }
  0x7a   :  { %5435 = vmatmul.mubr.f32.vlgmr.msra.gmra.mrb[2].mxu1 %v6181_v14 }
  0x7b   :  { %5769 = vmatpush3.bf16.msra.mxu1 %v5759_v48  ;;  %5441 = vmatprep.mubr.msk.f32.mxu1 %vm6065_vm0, %v6066_v1 }
  0x7c   :  { %5770 = vmatprep.subr.bf16.mxu1 %v6064_v0 }
  0x7e   :  { %5484 = vmatmul.mubr.f32.vlgmr.msra.gmra.mrb[2].mxu0 %v6184_v17 }
  0x7f   :  { %5790 = vmatpush3.bf16.msra.mxu0 %v5789_v55  ;;  %5490 = vmatprep.mubr.msk.f32.mxu0 %vm6065_vm0, %v6066_v1 }
  0x80   :  { %5791 = vmatprep.subr.bf16.mxu0 %v6064_v0 }
  0x82   :  { %5442 = vmatmul.mubr.f32.vlgmr.msra.gmra.mrb[2].mxu1 %v6184_v17 }
  0x83   :  { %5772 = vmatpush3.bf16.msra.mxu1 %v5771_v56  ;;  %5448 = vmatprep.mubr.msk.f32.mxu1 %vm6065_vm0, %v6066_v1 }
  0x84   :  { %5773 = vmatprep.subr.bf16.mxu1 %v6064_v0 }
  0x86   :  { %5491 = vmatmul.mubr.f32.vlgmr.msra.gmra.mrb[2].mxu0 %v6178_v8 }
  0x87   :  { %5793 = vmatpush3.bf16.msra.mxu0 %v5777_v45  ;;  %5497 = vmatprep.mubr.msk.f32.mxu0 %vm6065_vm0, %v6066_v1 }
  0x88   :  { %5530 = vmatprep.subr.mxu0 %v6066_v1 }
  0x8a   :  { %5449 = vmatmul.mubr.f32.vlgmr.msra.gmra.mrb[2].mxu1 %v6178_v8 }
  0x8b   :  { %5775 = vmatpush3.bf16.msra.mxu1 %v5759_v48  ;;  %5455 = vmatprep.mubr.msk.f32.mxu1 %vm6065_vm0, %v6066_v1 }
  0x8c   :  { %5500 = vmatprep.subr.mxu1 %v6066_v1 }
  0x8e   :  { %5498 = vmatmul.mubr.f32.vlgmr.msra.gmra.mrb[2].mxu0 %v6178_v8 }
  0x8f   :  { %5532 = vmatprep.mubr.msk.f32.mxu0 %vm6065_vm0, %v6066_v1 }
  0x92   :  { %5456 = vmatmul.mubr.f32.vlgmr.msra.gmra.mrb[2].mxu1 %v6178_v8 }
  0x93   :  { %5502 = vmatprep.mubr.msk.f32.mxu1 %vm6065_vm0, %v6066_v1 }
 0x135   :  { %v549_v57 = vpop.f32.mrb[0].mxu0 }
 0x136   :  { %v5415_v58 = vpop.f32.mrb[1].mxu0 }
 0x139   :  { %v324_v60 = vpop.f32.mrb[0].mxu1 }
 0x13a   :  { %v5794_v61 = vadd.f32 %v5221_v59, %v324_v60  ;;  %v5394_v62 = vpop.f32.mrb[1].mxu1 }
 0x13c   :  { %v5795_v63 = vadd.f32 %v5794_v61, %v549_v57 }
 0x13e   :  { %v1500_v0 = vsel %vm1497_vm2, %v5795_v63, 0  ;;  %3346 = vrot.lane.b32.xlu1 %v5795_v63, %s6067_s12  ;;  %v1492_v2 = vcombine.high %v5795_v63, %v5795_v63 }
 0x13f   :  { %v6281_v3 = vand.u32 4294901760, %v1500_v0 }
 0x140   :  { %v1950_v5 = vsel %vm1497_vm2, %v1492_v2, 0 }
 0x141   :  { %5501 = vmatpush3.xpose.msra.mxu1 %v6281_v3  ;;  %v6285_v6 = vand.u32 4294901760, %v1950_v5  ;;  %v1580_v9 = vsub.f32 %v1500_v0, %v6281_v3 }
 0x142   :  { %3800 = vrot.lane.b32.xlu1 %v1492_v2, %s6067_s12  ;;  %5505 = vmatprep.subr.mxu1 %v6066_v1 }
 0x143   :  { %5531 = vmatpush3.xpose.msra.mxu0 %v6285_v6  ;;  %v2030_v12 = vsub.f32 %v1950_v5, %v6285_v6  ;;  %v1581_v21 = vand.u32 4294901760, %v1580_v9 }
 0x144   :  { %5535 = vmatprep.subr.mxu0 %v6066_v1 }
 0x145   :  { %v2031_v25 = vand.u32 4294901760, %v2030_v12  ;;  %v1582_v28 = vsub.f32 %v1580_v9, %v1581_v21 }
 0x147   :  { %v2032_v31 = vsub.f32 %v2030_v12, %v2031_v25  ;;  %v1583_v34 = vand.u32 4294901760, %v1582_v28 }
 0x149   :  { %v2033_v36 = vand.u32 4294901760, %v2032_v31 }
 0x161   :  { %v1485_v16 = vpop.f32.mrb[2].mxu0 }
 0x162   :  { %v6301_v18 = vadd.f32 %v5223_v15, %v1485_v16  ;;  %v5499_v19 = vpop.f32.mrb[3].mxu0 }
 0x164   :  { %v1496_v24 = vcombine.high %v6301_v18, %v6301_v18  ;;  %v2442_v37 = vsel %vm2441_vm3, %v6301_v18, 0 }
 0x165   :  { %v1017_v8 = vpop.f32.mrb[2].mxu1  ;;  %v6352_v39 = vand.u32 4294901760, %v2442_v37 }
 0x166   :  { %v5796_v10 = vadd.f32 %v5222_v7, %v1017_v8  ;;  %v5457_v11 = vpop.f32.mrb[3].mxu1  ;;  %4743 = vrot.lane.b32.xlu1 %v1496_v24, %s6068_s5  ;;  %v2893_v38 = vsel %vm2441_vm3, %v1496_v24, 0 }
 0x167   :  { %v6355_v40 = vand.u32 4294901760, %v2893_v38 }
 0x168   :  { %v1498_v13 = vsel %vm1497_vm2, %v5796_v10, 0  ;;  %3344 = vrot.lane.b32.xlu0 %v5796_v10, %s6067_s12  ;;  %v1494_v14 = vcombine.high %v5796_v10, %v5796_v10 }
 0x169   :  { %v6299_v17 = vand.u32 4294901760, %v1498_v13 }
 0x16a   :  { %v1948_v20 = vsel %vm1497_vm2, %v1494_v14, 0 }
 0x16b   :  { %v1569_v22 = vsub.f32 %v1498_v13, %v6299_v17  ;;  %v6305_v23 = vand.u32 4294901760, %v1948_v20 }
 0x16c   :  { %3798 = vrot.lane.b32.xlu0 %v1494_v14, %s6067_s12 }
 0x16d   :  { %v2019_v26 = vsub.f32 %v1948_v20, %v6305_v23  ;;  %v1570_v27 = vand.u32 4294901760, %v1569_v22 }
 0x16f   :  { %v1571_v29 = vsub.f32 %v1569_v22, %v1570_v27  ;;  %v2020_v30 = vand.u32 4294901760, %v2019_v26 }
 0x170   :  { %4290 = vrot.lane.b32.xlu0 %v6301_v18, %s6068_s5  ;;  %v2522_v18 = vsub.f32 %v2442_v37, %v6352_v39 }
 0x171   :  { %v1572_v32 = vand.u32 4294901760, %v1571_v29  ;;  %v2021_v33 = vsub.f32 %v2019_v26, %v2020_v30 }
 0x173   :  { %5503 = vmatmul.mubr.f32.vlgmr.msra.gmra.mrb[4].mxu1 %v1572_v32  ;;  %v2022_v35 = vand.u32 4294901760, %v2021_v33 }
 0x174   :  { %5506 = vmatpush3.xpose.msra.mxu1 %v1583_v34  ;;  %5507 = vmatprep.mubr.msk.f32.mxu1 %vm6065_vm0, %v6066_v1 }
 0x175   :  { %5533 = vmatmul.mubr.f32.vlgmr.msra.gmra.mrb[4].mxu0 %v2022_v35  ;;  %5510 = vmatprep.subr.mxu1 %v6066_v1 }
 0x176   :  { %5536 = vmatpush3.xpose.msra.mxu0 %v2033_v36  ;;  %5537 = vmatprep.mubr.msk.f32.mxu0 %vm6065_vm0, %v6066_v1 }
 0x177   :  { %5540 = vmatprep.subr.mxu0 %v6066_v1 }
 0x17b   :  { %5508 = vmatmul.mubr.f32.vlgmr.msra.gmra.mrb[4].mxu1 %v6299_v17 }
 0x17c   :  { %5511 = vmatpush3.xpose.msra.mxu1 %v1580_v9  ;;  %5512 = vmatprep.mubr.msk.f32.mxu1 %vm6065_vm0, %v6066_v1 }
 0x17d   :  { %5538 = vmatmul.mubr.f32.vlgmr.msra.gmra.mrb[4].mxu0 %v6305_v23  ;;  %5515 = vmatprep.subr.mxu1 %v6066_v1 }
 0x17e   :  { %5541 = vmatpush3.xpose.msra.mxu0 %v2030_v12  ;;  %5542 = vmatprep.mubr.msk.f32.mxu0 %vm6065_vm0, %v6066_v1 }
 0x17f   :  { %5545 = vmatprep.subr.mxu0 %v6066_v1 }
 0x183   :  { %5513 = vmatmul.mubr.f32.vlgmr.msra.gmra.mrb[4].mxu1 %v1569_v22 }
 0x184   :  { %5516 = vmatpush3.xpose.msra.mxu1 %v6281_v3  ;;  %5517 = vmatprep.mubr.msk.f32.mxu1 %vm6065_vm0, %v6066_v1 }
 0x185   :  { %5543 = vmatmul.mubr.f32.vlgmr.msra.gmra.mrb[4].mxu0 %v2019_v26  ;;  %5520 = vmatprep.subr.mxu1 %v6066_v1 }
 0x186   :  { %5546 = vmatpush3.xpose.msra.mxu0 %v6285_v6  ;;  %5547 = vmatprep.mubr.msk.f32.mxu0 %vm6065_vm0, %v6066_v1 }
 0x187   :  { %5550 = vmatprep.subr.mxu0 %v6066_v1 }
 0x18b   :  { %5518 = vmatmul.mubr.f32.vlgmr.msra.gmra.mrb[4].mxu1 %v1570_v27 }
 0x18c   :  { %5521 = vmatpush3.xpose.msra.mxu1 %v1581_v21  ;;  %5522 = vmatprep.mubr.msk.f32.mxu1 %vm6065_vm0, %v6066_v1  ;;  %v2973_v21 = vsub.f32 %v2893_v38, %v6355_v40 }
 0x18d   :  { %5548 = vmatmul.mubr.f32.vlgmr.msra.gmra.mrb[4].mxu0 %v2020_v30  ;;  %5525 = vmatprep.subr.mxu1 %v6066_v1 }
 0x18e   :  { %5551 = vmatpush3.xpose.msra.mxu0 %v2031_v25  ;;  %5552 = vmatprep.mubr.msk.f32.mxu0 %vm6065_vm0, %v6066_v1  ;;  %v2523_v25 = vand.u32 4294901760, %v2522_v18  ;;  %v2974_v29 = vand.u32 4294901760, %v2973_v21 }
 0x18f   :  { %5555 = vmatprep.subr.mxu0 %v6066_v1 }
 0x190   :  { %v2524_v32 = vsub.f32 %v2522_v18, %v2523_v25  ;;  %v2975_v35 = vsub.f32 %v2973_v21, %v2974_v29 }
 0x192   :  { %v2525_v38 = vand.u32 4294901760, %v2524_v32 }
 0x193   :  { %5523 = vmatmul.mubr.f32.vlgmr.msra.gmra.mrb[4].mxu1 %v6299_v17 }
 0x194   :  { %5526 = vmatpush3.xpose.msra.mxu1 %v6281_v3  ;;  %5527 = vmatprep.mubr.msk.f32.mxu1 %vm6065_vm0, %v6066_v1 }
 0x195   :  { %5553 = vmatmul.mubr.f32.vlgmr.msra.gmra.mrb[4].mxu0 %v6305_v23  ;;  %5560 = vmatprep.subr.mxu1 %v6066_v1 }
 0x196   :  { %5556 = vmatpush3.xpose.msra.mxu0 %v6285_v6  ;;  %5557 = vmatprep.mubr.msk.f32.mxu0 %vm6065_vm0, %v6066_v1 }
 0x197   :  { %5590 = vmatprep.subr.mxu0 %v6066_v1 }
 0x19b   :  { %5528 = vmatmul.mubr.f32.vlgmr.msra.gmra.mrb[4].mxu1 %v6299_v17 }
 0x19c   :  { %5561 = vmatpush3.msra.mxu1 %v6352_v39  ;;  %5562 = vmatprep.mubr.msk.f32.mxu1 %vm6065_vm0, %v6066_v1 }
 0x19d   :  { %5558 = vmatmul.mubr.f32.vlgmr.msra.gmra.mrb[4].mxu0 %v6305_v23  ;;  %5565 = vmatprep.subr.mxu1 %v6066_v1 }
 0x19e   :  { %5591 = vmatpush3.msra.mxu0 %v6355_v40  ;;  %5592 = vmatprep.mubr.msk.f32.mxu0 %vm6065_vm0, %v6066_v1 }
 0x19f   :  { %5595 = vmatprep.subr.mxu0 %v6066_v1 }
 0x26e   :  { %v1944_v41 = vpop.f32.mrb[4].mxu1 }
 0x26f   :  { %v2399_v42 = vsel %vm2398_vm4, %v1944_v41, -inf  ;;  %v5529_v43 = vpop.f32.mrb[5].mxu1 }
 0x270   :  { %v2400_v44 = vrot.slane %v2399_v42, 4  ;;  %v2394_v45 = vpop.f32.mrb[4].mxu0  ;;  %v3345_v43 = vpop.permute.xlu0 %3344 }
 0x271   :  { %v2406_v46 = vsel %vm2398_vm4, %v2394_v45, -inf  ;;  %v5559_v47 = vpop.f32.mrb[5].mxu0 }
 0x272   :  { %v2401_v48 = vmax.f32 %v2399_v42, %v2400_v44  ;;  %v2407_v49 = vrot.slane %v2406_v46, 4  ;;  %v2976_v42 = vand.u32 4294901760, %v2975_v35  ;;  %v3347_v44 = vpop.permute.xlu1 %3346  ;;  %v3348_v47 = vsel %vm1497_vm2, %v3345_v43, 0 }
 0x274   :  { %v2402_v50 = vrot.slane %v2401_v48, 2  ;;  %v2408_v51 = vmax.f32 %v2406_v46, %v2407_v49 }
 0x276   :  { %v2403_v52 = vmax.f32 %v2401_v48, %v2402_v50  ;;  %v2409_v53 = vrot.slane %v2408_v51, 2  ;;  %v3801_v46 = vpop.permute.xlu1 %3800  ;;  %v3350_v48 = vsel %vm1497_vm2, %v3347_v44, 0 }
 0x277   :  { %v3804_v50 = vsel %vm1497_vm2, %v3801_v46, 0 }
 0x278   :  { %v2404_v54 = vrot.slane %v2403_v52, 1  ;;  %v2410_v55 = vmax.f32 %v2408_v51, %v2409_v53  ;;  %v6408_v51 = vand.u32 4294901760, %v3348_v47 }
 0x27a   :  { %v2405_v56 = vmax.f32 %v2403_v52, %v2404_v54  ;;  %v2411_v57 = vrot.slane %v2410_v55, 1  ;;  %v6411_v52 = vand.u32 4294901760, %v3350_v48  ;;  %v6418_v54 = vand.u32 4294901760, %v3804_v50 }
 0x27c   :  { %v2413_v58 = vsub.f32 %v1944_v41, %v2405_v56  ;;  %v2412_v59 = vmax.f32 %v2410_v55, %v2411_v57  ;;  %v3419_v55 = vsub.f32 %v3348_v47, %v6408_v51  ;;  %v3430_v56 = vsub.f32 %v3350_v48, %v6411_v52 }
 0x27e   :  { %v2415_v60 = vmul.f32 1.442695, %v2413_v58  ;;  %v2414_v61 = vsub.f32 %v2394_v45, %v2412_v59  ;;  %v3799_v45 = vpop.permute.xlu0 %3798  ;;  %v3884_v58 = vsub.f32 %v3804_v50, %v6418_v54  ;;  %v3420_v59 = vand.u32 4294901760, %v3419_v55 }
 0x27f   :  { %v3802_v49 = vsel %vm1497_vm2, %v3799_v45, 0 }
 0x280   :  { %5924 = vpow2.f32 %v2415_v60  ;;  %v2417_v62 = vmul.f32 1.442695, %v2414_v61  ;;  %v6415_v53 = vand.u32 4294901760, %v3802_v49  ;;  %v3431_v60 = vand.u32 4294901760, %v3430_v56 }
 0x282   :  { %5926 = vpow2.f32 %v2417_v62  ;;  %v3873_v57 = vsub.f32 %v3802_v49, %v6415_v53  ;;  %v3885_v62 = vand.u32 4294901760, %v3884_v58 }
 0x284   :  { %v3874_v61 = vand.u32 4294901760, %v3873_v57 }
 0x28a   :  { %v5925_v63 = vpop.eup %5924 }
 0x28b   :  { %v2419_v0 = vsel %vm2398_vm4, %v5925_v63, 0.0 }
 0x28c   :  { %v5927_v2 = vpop.eup %5926  ;;  %v2420_v3 = vrot.slane %v2419_v0, 4 }
 0x28d   :  { %v2426_v5 = vsel %vm2398_vm4, %v5927_v2, 0.0 }
 0x28e   :  { %v2421_v6 = vadd.f32 %v2420_v3, %v2419_v0  ;;  %v2427_v7 = vrot.slane %v2426_v5, 4  ;;  %v3875_v0 = vsub.f32 %v3873_v57, %v3874_v61 }
 0x290   :  { %v2422_v8 = vrot.slane %v2421_v6, 2  ;;  %v2428_v9 = vadd.f32 %v2427_v7, %v2426_v5  ;;  %v3876_v5 = vand.u32 4294901760, %v3875_v0  ;;  %v4291_v7 = vpop.permute.xlu0 %4290 }
 0x292   :  { %v2423_v10 = vadd.f32 %v2422_v8, %v2421_v6  ;;  %v2429_v11 = vrot.slane %v2428_v9, 2  ;;  %v4744_v8 = vpop.permute.xlu1 %4743 }
 0x294   :  { %v2424_v12 = vrot.slane %v2423_v10, 1  ;;  %v2430_v13 = vadd.f32 %v2429_v11, %v2428_v9  ;;  %v6482_v9 = vsel %vm2441_vm3, %v4291_v7, 0 }
 0x295   :  { %v6489_v11 = vand.u32 4294901760, %v6482_v9 }
 0x296   :  { %v2425_v14 = vadd.f32 %v2424_v12, %v2423_v10  ;;  %v2431_v15 = vrot.slane %v2430_v13, 1  ;;  %v6486_v10 = vsel %vm2441_vm3, %v4744_v8, 0 }
 0x297   :  { %v6493_v12 = vand.u32 4294901760, %v6486_v10 }
 0x298   :  { %5928 = vrcp.f32 %v2425_v14  ;;  %v2432_v16 = vadd.f32 %v2431_v15, %v2430_v13  ;;  %v6508_v13 = vcombine.high %v6175_v4, %v6175_v4 }
 0x29a   :  { %5930 = vrcp.f32 %v2432_v16  ;;  %5201 = vst.msk [vmem:[#allocation10 + $0x14] sm:$0xf] %vm3341_vm6, %v6508_v13 }
 0x2a2   :  { %v5929_v17 = vpop.eup %5928 }
 0x2a3   :  { %v2435_v19 = vmul.f32 %v5929_v17, %v5925_v63  ;;  %v3421_v63 = vsub.f32 %v3419_v55, %v3420_v59 }
 0x2a4   :  { %v5931_v20 = vpop.eup %5930 }
 0x2a5   :  { %v2436_v22 = vmul.f32 %v5931_v20, %v5927_v2  ;;  %v2439_v23 = vsel %vm2437_vm5, %v2435_v19, 0  ;;  %v3886_v2 = vsub.f32 %v3884_v58, %v3885_v62  ;;  %v3422_v3 = vand.u32 4294901760, %v3421_v63 }
 0x2a6   :  { %v6373_v24 = vand.u32 4294901760, %v2439_v23 }
 0x2a7   :  { %v2891_v26 = vsel %vm2437_vm5, %v2436_v22, 0  ;;  %v3887_v6 = vand.u32 4294901760, %v3886_v2 }
 0x2a8   :  { %v2511_v27 = vsub.f32 %v2439_v23, %v6373_v24  ;;  %v6377_v28 = vand.u32 4294901760, %v2891_v26 }
 0x2aa   :  { %v2512_v30 = vand.u32 4294901760, %v2511_v27  ;;  %v2962_v31 = vsub.f32 %v2891_v26, %v6377_v28 }
 0x2ac   :  { %v2513_v33 = vsub.f32 %v2511_v27, %v2512_v30  ;;  %v2963_v34 = vand.u32 4294901760, %v2962_v31 }
 0x2ae   :  { %v2514_v36 = vand.u32 4294901760, %v2513_v33  ;;  %v2964_v37 = vsub.f32 %v2962_v31, %v2963_v34 }
 0x2b0   :  { %5563 = vmatmul.mubr.f32.vlgmr.msra.gmra.mrb[6].mxu1 %v2514_v36  ;;  %v2965_v41 = vand.u32 4294901760, %v2964_v37 }
 0x2b1   :  { %5566 = vmatpush3.msra.mxu1 %v2525_v38  ;;  %5567 = vmatprep.mubr.msk.f32.mxu1 %vm6065_vm0, %v6066_v1 }
 0x2b2   :  { %5593 = vmatmul.mubr.f32.vlgmr.msra.gmra.mrb[6].mxu0 %v2965_v41  ;;  %5570 = vmatprep.subr.mxu1 %v6066_v1 }
 0x2b3   :  { %5596 = vmatpush3.msra.mxu0 %v2976_v42  ;;  %5597 = vmatprep.mubr.msk.f32.mxu0 %vm6065_vm0, %v6066_v1 }
 0x2b4   :  { %5600 = vmatprep.subr.mxu0 %v6066_v1 }
 0x2b8   :  { %5568 = vmatmul.mubr.f32.vlgmr.msra.gmra.mrb[6].mxu1 %v6373_v24 }
 0x2b9   :  { %5571 = vmatpush3.msra.mxu1 %v2522_v18  ;;  %5572 = vmatprep.mubr.msk.f32.mxu1 %vm6065_vm0, %v6066_v1 }
 0x2ba   :  { %5598 = vmatmul.mubr.f32.vlgmr.msra.gmra.mrb[6].mxu0 %v6377_v28  ;;  %5575 = vmatprep.subr.mxu1 %v6066_v1 }
 0x2bb   :  { %5601 = vmatpush3.msra.mxu0 %v2973_v21  ;;  %5602 = vmatprep.mubr.msk.f32.mxu0 %vm6065_vm0, %v6066_v1 }
 0x2bc   :  { %5605 = vmatprep.subr.mxu0 %v6066_v1 }
 0x2c0   :  { %5573 = vmatmul.mubr.f32.vlgmr.msra.gmra.mrb[6].mxu1 %v2511_v27 }
 0x2c1   :  { %5576 = vmatpush3.msra.mxu1 %v6352_v39  ;;  %5577 = vmatprep.mubr.msk.f32.mxu1 %vm6065_vm0, %v6066_v1 }
 0x2c2   :  { %5603 = vmatmul.mubr.f32.vlgmr.msra.gmra.mrb[6].mxu0 %v2962_v31  ;;  %5580 = vmatprep.subr.mxu1 %v6066_v1 }
 0x2c3   :  { %5606 = vmatpush3.msra.mxu0 %v6355_v40  ;;  %5607 = vmatprep.mubr.msk.f32.mxu0 %vm6065_vm0, %v6066_v1 }
 0x2c4   :  { %5610 = vmatprep.subr.mxu0 %v6066_v1 }
 0x2c8   :  { %5578 = vmatmul.mubr.f32.vlgmr.msra.gmra.mrb[6].mxu1 %v2512_v30 }
 0x2c9   :  { %5581 = vmatpush3.msra.mxu1 %v2523_v25  ;;  %5582 = vmatprep.mubr.msk.f32.mxu1 %vm6065_vm0, %v6066_v1 }
 0x2ca   :  { %5608 = vmatmul.mubr.f32.vlgmr.msra.gmra.mrb[6].mxu0 %v2963_v34  ;;  %5585 = vmatprep.subr.mxu1 %v6066_v1 }
 0x2cb   :  { %5611 = vmatpush3.msra.mxu0 %v2974_v29  ;;  %5612 = vmatprep.mubr.msk.f32.mxu0 %vm6065_vm0, %v6066_v1 }
 0x2cc   :  { %5615 = vmatprep.subr.mxu0 %v6066_v1 }
 0x2d0   :  { %5583 = vmatmul.mubr.f32.vlgmr.msra.gmra.mrb[6].mxu1 %v6373_v24 }
 0x2d1   :  { %5586 = vmatpush3.msra.mxu1 %v6352_v39  ;;  %5587 = vmatprep.mubr.msk.f32.mxu1 %vm6065_vm0, %v6066_v1  ;;  %v3432_v39 = vsub.f32 %v3430_v56, %v3431_v60 }
 0x2d2   :  { %5613 = vmatmul.mubr.f32.vlgmr.msra.gmra.mrb[6].mxu0 %v6377_v28  ;;  %5620 = vmatprep.subr.mxu1 %v6066_v1 }
 0x2d3   :  { %5616 = vmatpush3.msra.mxu0 %v6355_v40  ;;  %5617 = vmatprep.mubr.msk.f32.mxu0 %vm6065_vm0, %v6066_v1  ;;  %v3433_v40 = vand.u32 4294901760, %v3432_v39  ;;  %v4828_v39 = vsub.f32 %v6486_v10, %v6493_v12 }
 0x2d4   :  { %5650 = vmatprep.subr.mxu0 %v6066_v1 }
 0x2d5   :  { %v4829_v8 = vand.u32 4294901760, %v4828_v39 }
 0x2d8   :  { %5588 = vmatmul.mubr.f32.vlgmr.msra.gmra.mrb[6].mxu1 %v6373_v24 }
 0x2d9   :  { %5621 = vmatpush3.xpose.msra.mxu1 %v6411_v52  ;;  %5622 = vmatprep.mubr.msk.f32.mxu1 %vm6065_vm0, %v6066_v1 }
 0x2da   :  { %5618 = vmatmul.mubr.f32.vlgmr.msra.gmra.mrb[6].mxu0 %v6377_v28  ;;  %5625 = vmatprep.subr.mxu1 %v6066_v1 }
 0x2db   :  { %5651 = vmatpush3.xpose.msra.mxu0 %v6418_v54  ;;  %5652 = vmatprep.mubr.msk.f32.mxu0 %vm6065_vm0, %v6066_v1 }
 0x2dc   :  { %5623 = vmatmul.mubr.f32.vlgmr.msra.gmra.mrb[8].mxu1 %v3422_v3  ;;  %5655 = vmatprep.subr.mxu0 %v6066_v1 }
 0x2dd   :  { %5626 = vmatpush3.xpose.msra.mxu1 %v3433_v40  ;;  %5627 = vmatprep.mubr.msk.f32.mxu1 %vm6065_vm0, %v6066_v1 }
 0x2de   :  { %5653 = vmatmul.mubr.f32.vlgmr.msra.gmra.mrb[8].mxu0 %v3876_v5  ;;  %5630 = vmatprep.subr.mxu1 %v6066_v1 }
 0x2df   :  { %5656 = vmatpush3.xpose.msra.mxu0 %v3887_v6  ;;  %5657 = vmatprep.mubr.msk.f32.mxu0 %vm6065_vm0, %v6066_v1 }
 0x2e0   :  { %5660 = vmatprep.subr.mxu0 %v6066_v1 }
 0x2e4   :  { %5628 = vmatmul.mubr.f32.vlgmr.msra.gmra.mrb[8].mxu1 %v6408_v51 }
 0x2e5   :  { %5631 = vmatpush3.xpose.msra.mxu1 %v3430_v56  ;;  %5632 = vmatprep.mubr.msk.f32.mxu1 %vm6065_vm0, %v6066_v1 }
 0x2e6   :  { %5658 = vmatmul.mubr.f32.vlgmr.msra.gmra.mrb[8].mxu0 %v6415_v53  ;;  %5635 = vmatprep.subr.mxu1 %v6066_v1 }
 0x2e7   :  { %5661 = vmatpush3.xpose.msra.mxu0 %v3884_v58  ;;  %5662 = vmatprep.mubr.msk.f32.mxu0 %vm6065_vm0, %v6066_v1 }
 0x2e8   :  { %5665 = vmatprep.subr.mxu0 %v6066_v1 }
 0x2ec   :  { %5633 = vmatmul.mubr.f32.vlgmr.msra.gmra.mrb[8].mxu1 %v3419_v55 }
 0x2ed   :  { %5636 = vmatpush3.xpose.msra.mxu1 %v6411_v52  ;;  %5637 = vmatprep.mubr.msk.f32.mxu1 %vm6065_vm0, %v6066_v1 }
 0x2ee   :  { %5663 = vmatmul.mubr.f32.vlgmr.msra.gmra.mrb[8].mxu0 %v3873_v57  ;;  %5640 = vmatprep.subr.mxu1 %v6066_v1 }
 0x2ef   :  { %5666 = vmatpush3.xpose.msra.mxu0 %v6418_v54  ;;  %5667 = vmatprep.mubr.msk.f32.mxu0 %vm6065_vm0, %v6066_v1 }
 0x2f0   :  { %5670 = vmatprep.subr.mxu0 %v6066_v1 }
 0x2f4   :  { %5638 = vmatmul.mubr.f32.vlgmr.msra.gmra.mrb[8].mxu1 %v3420_v59 }
 0x2f5   :  { %5641 = vmatpush3.xpose.msra.mxu1 %v3431_v60  ;;  %5642 = vmatprep.mubr.msk.f32.mxu1 %vm6065_vm0, %v6066_v1 }
 0x2f6   :  { %5668 = vmatmul.mubr.f32.vlgmr.msra.gmra.mrb[8].mxu0 %v3874_v61  ;;  %5645 = vmatprep.subr.mxu1 %v6066_v1  ;;  %v4375_v61 = vsub.f32 %v6482_v9, %v6489_v11 }
 0x2f7   :  { %5671 = vmatpush3.xpose.msra.mxu0 %v3885_v62  ;;  %5672 = vmatprep.mubr.msk.f32.mxu0 %vm6065_vm0, %v6066_v1 }
 0x2f8   :  { %5675 = vmatprep.subr.mxu0 %v6066_v1  ;;  %v4376_v40 = vand.u32 4294901760, %v4375_v61 }
 0x2fc   :  { %5643 = vmatmul.mubr.f32.vlgmr.msra.gmra.mrb[8].mxu1 %v6408_v51 }
 0x2fd   :  { %5646 = vmatpush3.xpose.msra.mxu1 %v6411_v52  ;;  %5647 = vmatprep.mubr.msk.f32.mxu1 %vm6065_vm0, %v6066_v1 }
 0x2fe   :  { %5673 = vmatmul.mubr.f32.vlgmr.msra.gmra.mrb[8].mxu0 %v6415_v53  ;;  %5680 = vmatprep.subr.mxu1 %v6066_v1 }
 0x2ff   :  { %5676 = vmatpush3.xpose.msra.mxu0 %v6418_v54  ;;  %5677 = vmatprep.mubr.msk.f32.mxu0 %vm6065_vm0, %v6066_v1 }
 0x300   :  { %5710 = vmatprep.subr.mxu0 %v6066_v1 }
 0x304   :  { %5648 = vmatmul.mubr.f32.vlgmr.msra.gmra.mrb[8].mxu1 %v6408_v51 }
 0x305   :  { %5681 = vmatpush3.msra.mxu1 %v6489_v11  ;;  %5682 = vmatprep.mubr.msk.f32.mxu1 %vm6065_vm0, %v6066_v1 }
 0x306   :  { %5678 = vmatmul.mubr.f32.vlgmr.msra.gmra.mrb[8].mxu0 %v6415_v53  ;;  %5685 = vmatprep.subr.mxu1 %v6066_v1 }
 0x307   :  { %5711 = vmatpush3.msra.mxu0 %v6493_v12  ;;  %5712 = vmatprep.mubr.msk.f32.mxu0 %vm6065_vm0, %v6066_v1 }
 0x308   :  { %5715 = vmatprep.subr.mxu0 %v6066_v1 }
 0x3ab   :  { %v2886_v14 = vpop.f32.mrb[6].mxu1 }
 0x3ac   :  { %v5798_v15 = vadd.f32 %v2886_v14, %v6175_v4  ;;  %v5589_v16 = vpop.f32.mrb[7].mxu1 }
 0x3ad   :  { %v3337_v17 = vpop.f32.mrb[6].mxu0  ;;  %v4377_v16 = vsub.f32 %v4375_v61, %v4376_v40 }
 0x3ae   :  { %3342 = vst.msk [vmem:[#allocation10] sm:$0xf] %vm3341_vm6, %v5798_v15  ;;  %v5799_v18 = vadd.f32 %v3337_v17, %v6508_v13  ;;  %v5619_v19 = vpop.f32.mrb[7].mxu0 }
 0x3b0   :  { %3343 = vst.msk [vmem:[#allocation10 + $0xc] sm:$0xf] %vm3341_vm6, %v5799_v18  ;;  %v4830_v18 = vsub.f32 %v4828_v39, %v4829_v8 }
 0x3d7   :  { %v3794_v20 = vpop.f32.mrb[8].mxu1 }
 0x3d8   :  { %v4252_v21 = vsel %vm2398_vm4, %v3794_v20, -inf  ;;  %v5649_v22 = vpop.f32.mrb[9].mxu1 }
 0x3d9   :  { %v4253_v23 = vrot.slane %v4252_v21, 4  ;;  %v4248_v24 = vpop.f32.mrb[8].mxu0  ;;  %v4831_v22 = vand.u32 4294901760, %v4830_v18 }
 0x3da   :  { %v4259_v25 = vsel %vm2398_vm4, %v4248_v24, -inf  ;;  %v5679_v26 = vpop.f32.mrb[9].mxu0 }
 0x3db   :  { %v4254_v27 = vmax.f32 %v4252_v21, %v4253_v23  ;;  %v4260_v28 = vrot.slane %v4259_v25, 4  ;;  %v4378_v21 = vand.u32 4294901760, %v4377_v16 }
 0x3dd   :  { %v4255_v29 = vrot.slane %v4254_v27, 2  ;;  %v4261_v30 = vmax.f32 %v4259_v25, %v4260_v28 }
 0x3df   :  { %v4256_v31 = vmax.f32 %v4254_v27, %v4255_v29  ;;  %v4262_v32 = vrot.slane %v4261_v30, 2 }
 0x3e1   :  { %v4257_v33 = vrot.slane %v4256_v31, 1  ;;  %v4263_v34 = vmax.f32 %v4261_v30, %v4262_v32 }
 0x3e3   :  { %v4258_v35 = vmax.f32 %v4256_v31, %v4257_v33  ;;  %v4264_v36 = vrot.slane %v4263_v34, 1 }
 0x3e5   :  { %v4266_v37 = vsub.f32 %v3794_v20, %v4258_v35  ;;  %v4265_v38 = vmax.f32 %v4263_v34, %v4264_v36 }
 0x3e7   :  { %v4268_v41 = vmul.f32 1.442695, %v4266_v37  ;;  %v4267_v42 = vsub.f32 %v4248_v24, %v4265_v38 }
 0x3e9   :  { %5932 = vpow2.f32 %v4268_v41  ;;  %v4270_v43 = vmul.f32 1.442695, %v4267_v42 }
 0x3eb   :  { %5934 = vpow2.f32 %v4270_v43 }
 0x3f3   :  { %v5933_v44 = vpop.eup %5932 }
 0x3f4   :  { %v4272_v45 = vsel %vm2398_vm4, %v5933_v44, 0.0 }
 0x3f5   :  { %v5935_v46 = vpop.eup %5934  ;;  %v4273_v47 = vrot.slane %v4272_v45, 4 }
 0x3f6   :  { %v4279_v48 = vsel %vm2398_vm4, %v5935_v46, 0.0 }
 0x3f7   :  { %v4274_v49 = vadd.f32 %v4273_v47, %v4272_v45  ;;  %v4280_v50 = vrot.slane %v4279_v48, 4 }
 0x3f9   :  { %v4275_v51 = vrot.slane %v4274_v49, 2  ;;  %v4281_v52 = vadd.f32 %v4280_v50, %v4279_v48 }
 0x3fb   :  { %v4276_v53 = vadd.f32 %v4275_v51, %v4274_v49  ;;  %v4282_v54 = vrot.slane %v4281_v52, 2 }
 0x3fd   :  { %v4277_v55 = vrot.slane %v4276_v53, 1  ;;  %v4283_v56 = vadd.f32 %v4282_v54, %v4281_v52 }
 0x3ff   :  { %v4278_v57 = vadd.f32 %v4277_v55, %v4276_v53  ;;  %v4284_v58 = vrot.slane %v4283_v56, 1 }
 0x401   :  { %5936 = vrcp.f32 %v4278_v57  ;;  %v4285_v59 = vadd.f32 %v4284_v58, %v4283_v56 }
 0x403   :  { %5938 = vrcp.f32 %v4285_v59 }
 0x40b   :  { %v5937_v60 = vpop.eup %5936 }
 0x40c   :  { %v4288_v62 = vmul.f32 %v5937_v60, %v5933_v44 }
 0x40d   :  { %v5939_v63 = vpop.eup %5938 }
 0x40e   :  { %v4289_v0 = vmul.f32 %v5939_v63, %v5935_v46  ;;  %v4293_v2 = vsel %vm2437_vm5, %v4288_v62, 0 }
 0x40f   :  { %v4363_v3 = vand.u32 4294901760, %v4293_v2 }
 0x410   :  { %v4746_v5 = vsel %vm2437_vm5, %v4289_v0, 0 }
 0x411   :  { %v4364_v6 = vsub.f32 %v4293_v2, %v4363_v3  ;;  %v4816_v7 = vand.u32 4294901760, %v4746_v5 }
 0x413   :  { %v4365_v14 = vand.u32 4294901760, %v4364_v6  ;;  %v4817_v15 = vsub.f32 %v4746_v5, %v4816_v7 }
 0x415   :  { %v4366_v17 = vsub.f32 %v4364_v6, %v4365_v14  ;;  %v4818_v9 = vand.u32 4294901760, %v4817_v15 }
 0x417   :  { %v4367_v19 = vand.u32 4294901760, %v4366_v17  ;;  %v4819_v20 = vsub.f32 %v4817_v15, %v4818_v9 }
 0x419   :  { %5683 = vmatmul.mubr.f32.vlgmr.msra.gmra.mrb[10].mxu1 %v4367_v19  ;;  %v4820_v10 = vand.u32 4294901760, %v4819_v20 }
 0x41a   :  { %5686 = vmatpush3.msra.mxu1 %v4378_v21  ;;  %5687 = vmatprep.mubr.msk.f32.mxu1 %vm6065_vm0, %v6066_v1 }
 0x41b   :  { %5713 = vmatmul.mubr.f32.vlgmr.msra.gmra.mrb[10].mxu0 %v4820_v10  ;;  %5690 = vmatprep.subr.mxu1 %v6066_v1 }
 0x41c   :  { %5716 = vmatpush3.msra.mxu0 %v4831_v22  ;;  %5717 = vmatprep.mubr.msk.f32.mxu0 %vm6065_vm0, %v6066_v1 }
 0x41d   :  { %5720 = vmatprep.subr.mxu0 %v6066_v1 }
 0x421   :  { %5688 = vmatmul.mubr.f32.vlgmr.msra.gmra.mrb[10].mxu1 %v4363_v3 }
 0x422   :  { %5691 = vmatpush3.msra.mxu1 %v4375_v61  ;;  %5692 = vmatprep.mubr.msk.f32.mxu1 %vm6065_vm0, %v6066_v1 }
 0x423   :  { %5718 = vmatmul.mubr.f32.vlgmr.msra.gmra.mrb[10].mxu0 %v4816_v7  ;;  %5695 = vmatprep.subr.mxu1 %v6066_v1 }
 0x424   :  { %5721 = vmatpush3.msra.mxu0 %v4828_v39  ;;  %5722 = vmatprep.mubr.msk.f32.mxu0 %vm6065_vm0, %v6066_v1 }
 0x425   :  { %5725 = vmatprep.subr.mxu0 %v6066_v1 }
 0x429   :  { %5693 = vmatmul.mubr.f32.vlgmr.msra.gmra.mrb[10].mxu1 %v4364_v6 }
 0x42a   :  { %5696 = vmatpush3.msra.mxu1 %v6489_v11  ;;  %5697 = vmatprep.mubr.msk.f32.mxu1 %vm6065_vm0, %v6066_v1 }
 0x42b   :  { %5723 = vmatmul.mubr.f32.vlgmr.msra.gmra.mrb[10].mxu0 %v4817_v15  ;;  %5700 = vmatprep.subr.mxu1 %v6066_v1 }
 0x42c   :  { %5726 = vmatpush3.msra.mxu0 %v6493_v12  ;;  %5727 = vmatprep.mubr.msk.f32.mxu0 %vm6065_vm0, %v6066_v1 }
 0x42d   :  { %5730 = vmatprep.subr.mxu0 %v6066_v1 }
 0x431   :  { %5698 = vmatmul.mubr.f32.vlgmr.msra.gmra.mrb[10].mxu1 %v4365_v14 }
 0x432   :  { %5701 = vmatpush3.msra.mxu1 %v4376_v40  ;;  %5702 = vmatprep.mubr.msk.f32.mxu1 %vm6065_vm0, %v6066_v1 }
 0x433   :  { %5728 = vmatmul.mubr.f32.vlgmr.msra.gmra.mrb[10].mxu0 %v4818_v9  ;;  %5705 = vmatprep.subr.mxu1 %v6066_v1 }
 0x434   :  { %5731 = vmatpush3.msra.mxu0 %v4829_v8  ;;  %5732 = vmatprep.mubr.msk.f32.mxu0 %vm6065_vm0, %v6066_v1 }
 0x435   :  { %5735 = vmatprep.subr.mxu0 %v6066_v1 }
 0x439   :  { %5703 = vmatmul.mubr.f32.vlgmr.msra.gmra.mrb[10].mxu1 %v4363_v3 }
 0x43a   :  { %5706 = vmatpush3.msra.mxu1 %v6489_v11  ;;  %5707 = vmatprep.mubr.msk.f32.mxu1 %vm6065_vm0, %v6066_v1 }
 0x43b   :  { %5733 = vmatmul.mubr.f32.vlgmr.msra.gmra.mrb[10].mxu0 %v4816_v7 }
 0x43c   :  { %5736 = vmatpush3.msra.mxu0 %v6493_v12  ;;  %5737 = vmatprep.mubr.msk.f32.mxu0 %vm6065_vm0, %v6066_v1 }
 0x441   :  { %5708 = vmatmul.mubr.f32.vlgmr.msra.gmra.mrb[10].mxu1 %v4363_v3 }
 0x443   :  { %5738 = vmatmul.mubr.f32.vlgmr.msra.gmra.mrb[10].mxu0 %v4816_v7 }
 0x514   :  { %v4739_v23 = vpop.f32.mrb[10].mxu1 }
 0x515   :  { %v5800_v24 = vadd.f32 %v4739_v23, %v6175_v4  ;;  %v5709_v25 = vpop.f32.mrb[11].mxu1 }
 0x516   :  { %v5192_v26 = vpop.f32.mrb[10].mxu0 }
 0x517   :  { %5197 = vst.msk [vmem:[#allocation10 + $0x4] sm:$0xf] %vm3341_vm6, %v5800_v24  ;;  %v5801_v11 = vadd.f32 %v5192_v26, %v6508_v13  ;;  %v5739_v27 = vpop.f32.mrb[11].mxu0 }
 0x519   :  { %5198 = vst.msk [vmem:[#allocation10 + $0x10] sm:$0xf] %vm3341_vm6, %v5801_v11 }
 0x51a   :  { %6039 = shalt.err (!%p6036_p8)
}
 0x51b   :  { %s6040_s10 = scalar_lea.hbm %s6581_s7, 384 }
 0x51c   :  { %p6041_p9 = scmp.ne.s32.totalorder %s6581_s7, %s6040_s10  ;;  %p6044_p10 = scmp.lt.u32.totalorder %s6040_s10, %s6581_s7 }
 0x51e   :  { %p6046_p11 = pnand %p6044_p10, %p6041_p9 }
 0x520   :  { %6049 = shalt.err (!%p6046_p11)
}
 0x521   :  { %s6070_s16 = smov 64   ;;  %s6071_s17 = smov 4  }
 0x522   :  { %5213 = dma.vmem_to_hbm [thread:$0]  %s5208_s29, 384, %s6581_s7, [#allocation4], %s6070_s16, %s6070_s16, %s6071_s17  }
 0x523   :  { %6056 = dma.done.wait [#allocation4], 384  }
 0x524   :  { %6057 = vsyncadd [#allocation4], 4294966912 }
 0x525   :  { %5217 = vsyncpa [#allocation3], 1 }
 0x526   :  { %5218 = vsyncpa [#allocation6], 1 }
 0x527   :  { %5219 = vsyncpa [#allocation9], 1 }
 0x528   :  { %5220 = vsyncpa [#allocation4], 1 }

</bundles_post_ra>
